<compile_context>
chip_gen: v7x
topology: tpu7x:2x2x1
jax: 0.10.0
libtpu: 0.0.40
codegen_flags: <defaults>
</compile_context>

<pallas_src>
import math

import jax
import jax.numpy as jnp
from jax import lax
from jax.experimental import pallas as pl
from jax.experimental.pallas import tpu as pltpu

_LANE = 128
_SUBLANE = 8
_VMEM_BUDGET = 24 * 1024 * 1024   # conservative per-step footprint (v7x-safe)
_VMEM_LIMIT = 32 * 1024 * 1024    # scoped VMEM limit handed to Mosaic


def _round_up(x, m):
    return ((x + m - 1) // m) * m


def _make_kernel(bb, s_pad, s_true, dp, sp, with_probs):
    """Kernel closure with static block sizes baked in."""

    def kernel(x_ref, wqkv_ref, bqkv_ref, out_ref, *rest):
        probs_ref = rest[0] if with_probs else None

        # Fused QKV projection over the whole batch block:
        #   (bb*Sp, H) @ (H, 3*Dp) -- native-dtype operands, f32 accumulate.
        qkv = jnp.dot(x_ref[...], wqkv_ref[...],
                      preferred_element_type=jnp.float32)
        qkv = (qkv + bqkv_ref[...]).reshape(bb, s_pad, 3 * dp)

        q = qkv[:, :, 0 * dp:1 * dp]     # 1/sqrt(D) already folded into Wq/bq
        k = qkv[:, :, 1 * dp:2 * dp]
        v = qkv[:, :, 2 * dp:3 * dp]

        # scores = q @ k^T for every batch element in the block (batched MXU
        # matmul, contracting the last dims -- no materialized transpose).
        scores = jnp.einsum("bqd,bkd->bqk", q, k,
                            preferred_element_type=jnp.float32)   # (bb,Sp,Sp)

        if s_pad > s_true:
            # Mask padded key rows so they get exactly-zero probability.
            col = lax.broadcasted_iota(jnp.int32, (1, 1, s_pad), 2)
            scores = jnp.where(col < s_true, scores, -1e30)

        # Numerically stable softmax (f32); reciprocal goes to the EUP slot.
        m = jnp.max(scores, axis=-1, keepdims=True)
        e = jnp.exp(scores - m)
        denom = jnp.sum(e, axis=-1, keepdims=True)
        probs = e * pl.reciprocal(denom, approx=True)

        # TODO(synk): nn.Dropout is identity at inference; training-mode
        # stochastic dropout is not implemented here.

        out = jnp.einsum("bqk,bkd->bqd", probs, v,
                         preferred_element_type=jnp.float32)      # (bb,Sp,Dp)
        out_ref[...] = out.astype(out_ref.dtype)

        if with_probs:
            if sp > s_pad:
                # One zero-pad per grid step (not per batch element) so the
                # probs store stays lane-dense (unmasked vst).
                pad = jnp.zeros((bb, s_pad, sp - s_pad), jnp.float32)
                probs = jnp.concatenate([probs, pad], axis=-1)
            probs_ref[...] = probs.astype(probs_ref.dtype)

    return kernel


def _vmem_bytes(bb, s_pad, H, dp, sp, in_isz, out_isz, probs_isz, with_probs):
    """Rough per-grid-step VMEM footprint (double-buffered I/O + f32 temps)."""
    rows = bb * s_pad
    total = 0
    total += 2 * rows * H * in_isz               # x block (double-buffered)
    total += 2 * H * 3 * dp * in_isz             # fused weight
    total += 2 * 3 * dp * 4                      # fused bias
    total += 2 * rows * dp * out_isz             # out block
    if with_probs:
        total += 2 * rows * sp * probs_isz       # probs block
    total += rows * 3 * dp * 4                   # f32 qkv slab
    total += 3 * bb * s_pad * s_pad * 4          # scores / exp / probs (f32)
    if with_probs:
        total += bb * s_pad * sp * 4             # padded probs before store
    total += rows * dp * 4                       # f32 out before cast
    return total


def _choose_block_b(B, s_pad, H, dp, sp, in_isz, out_isz, probs_isz,
                    with_probs, budget):
    best = 1
    for d in range(1, B + 1):
        if B % d:
            continue
        if _vmem_bytes(d, s_pad, H, dp, sp, in_isz, out_isz, probs_isz,
                       with_probs) > budget:
            continue
        steps = B // d
        rows = d * s_pad
        if B > 1 and steps < 2:
            continue   # keep >=2 grid steps: DMA pipelining + both v7x TCs
        if rows > 512:
            continue   # a bigger fused-QKV M dim buys nothing past ~512 rows
        if steps < 4 and best * s_pad >= 256:
            continue   # prefer >=4 steps once the matmul M dim is decent
        best = d
    return best


def attention_head(x, wq, bq, wk, bk, wv, bv, *, block_b=None,
                   with_probs=True, unpad=True, probs_dtype=None):
    """x: (B, S, H); wq/wk/wv: (H, D) (pre-transposed); bq/bk/bv: (D,).

    Returns (attention_output, attention_probs).  With unpad=True shapes are
    (B, S, D) / (B, S, S).  With unpad=False the lane-dense padded slabs
    (B, Sp, Dp) / (B, Sp, SPp) are returned directly (no extra HBM pass) and
    the consumer slices lazily.  with_probs=False skips the probs output.
    """
    B, S, H = x.shape
    D = wq.shape[1]
    scale = 1.0 / math.sqrt(D)

    dp = max(_LANE, _round_up(D, _LANE))     # lane-dense head dim
    sp = max(_LANE, _round_up(S, _LANE))     # lane-dense key dim (probs cols)
    s_pad = _round_up(S, _SUBLANE)           # sublane-aligned sequence rows

    in_isz = jnp.dtype(x.dtype).itemsize
    out_isz = in_isz
    p_dtype = (jnp.dtype(probs_dtype) if probs_dtype is not None
               else jnp.dtype(x.dtype))
    probs_isz = p_dtype.itemsize

    # Host-side packing: fold the 1/sqrt(D) scale into the query projection
    # (in f32, then cast), pad each projection to dp lanes, fuse into a single
    # (H, 3*dp) weight and (1, 3*dp) f32 bias.
    def pad_w(w):
        return jnp.pad(w.astype(jnp.float32), ((0, 0), (0, dp - D)))

    def pad_b(b):
        return jnp.pad(b.astype(jnp.float32), (0, dp - D))

    wqkv = jnp.concatenate([pad_w(wq) * scale, pad_w(wk), pad_w(wv)],
                           axis=1).astype(x.dtype)                 # (H, 3*dp)
    bqkv = jnp.concatenate([pad_b(bq) * scale, pad_b(bk), pad_b(bv)]
                           ).reshape(1, 3 * dp).astype(jnp.float32)

    # Pad the sequence dim to a sublane multiple if needed (padded key rows
    # are masked off inside the kernel so softmax ignores them).
    if s_pad != S:
        x = jnp.pad(x, ((0, 0), (0, s_pad - S), (0, 0)))
    x2d = x.reshape(B * s_pad, H)

    # VMEM-budgeted batch blocking: multiple grid steps so input/output DMA
    # overlaps compute and both v7x TensorCores get work.
    bb = _choose_block_b(B, s_pad, H, dp, sp, in_isz, out_isz, probs_isz,
                         with_probs, _VMEM_BUDGET)
    if block_b is not None and B % int(block_b) == 0:
        cand = int(block_b)
        if _vmem_bytes(cand, s_pad, H, dp, sp, in_isz, out_isz, probs_isz,
                       with_probs) <= _VMEM_BUDGET:
            bb = cand
    grid = (B // bb,)

    out_struct = jax.ShapeDtypeStruct((B, s_pad, dp), x.dtype)
    out_spec = pl.BlockSpec((bb, s_pad, dp), lambda i: (i, 0, 0))
    if with_probs:
        out_shape = (out_struct,
                     jax.ShapeDtypeStruct((B, s_pad, sp), p_dtype))
        out_specs = (out_spec,
                     pl.BlockSpec((bb, s_pad, sp), lambda i: (i, 0, 0)))
    else:
        out_shape = out_struct
        out_specs = out_spec

    flops = (2 * B * s_pad * H * 3 * dp         # fused QKV projection
             + 2 * B * s_pad * s_pad * dp       # q @ k^T
             + 2 * B * s_pad * s_pad * dp)      # probs @ v
    transcendentals = B * s_pad * s_pad + B * s_pad
    bytes_accessed = (B * s_pad * H * in_isz + H * 3 * dp * in_isz
                      + 3 * dp * 4 + B * s_pad * dp * out_isz
                      + (B * s_pad * sp * probs_isz if with_probs else 0))

    result = pl.pallas_call(
        _make_kernel(bb, s_pad, S, dp, sp, with_probs),
        out_shape=out_shape,
        grid_spec=pl.GridSpec(
            grid=grid,
            in_specs=[
                pl.BlockSpec((bb * s_pad, H), lambda i: (i, 0)),  # activations
                pl.BlockSpec((H, 3 * dp), lambda i: (0, 0)),      # resident W
                pl.BlockSpec((1, 3 * dp), lambda i: (0, 0)),      # resident b
            ],
            out_specs=out_specs,
        ),
        compiler_params=pltpu.CompilerParams(
            dimension_semantics=("parallel",),
            vmem_limit_bytes=_VMEM_LIMIT),
        cost_estimate=pl.CostEstimate(
            flops=flops, transcendentals=transcendentals,
            bytes_accessed=bytes_accessed),
    )(x2d, wqkv, bqkv)

    if with_probs:
        out_pad, probs_pad = result
    else:
        out_pad, probs_pad = result, None

    if not unpad:
        return out_pad, probs_pad

    out = out_pad[:, :S, :D]
    probs = probs_pad[:, :S, :S] if with_probs else None
    return out, probs


def _reference(x, wq, bq, wk, bk, wv, bv):
    """Pure-JAX reference mirroring the PyTorch forward (eval mode)."""
    q = jnp.einsum("bsh,hd->bsd", x, wq) + bq
    k = jnp.einsum("bsh,hd->bsd", x, wk) + bk
    v = jnp.einsum("bsh,hd->bsd", x, wv) + bv
    scores = jnp.einsum("bqd,bkd->bqk", q, k) / math.sqrt(wq.shape[1])
    probs = jax.nn.softmax(scores, axis=-1)
    out = jnp.einsum("bqk,bkd->bqd", probs, v)
    return out, probs


if __name__ == "__main__":
    # Small shapes consistent with the module:
    #   batch=2, seq=8, hidden_size=32, attention_head_size=16, dropout=0.0
    B, S, H, D = 2, 8, 32, 16

    key = jax.random.PRNGKey(0)
    kx, kq, kbq, kk, kbk, kv, kbv = jax.random.split(key, 7)

    bound = 1.0 / math.sqrt(H)
    x = jax.random.normal(kx, (B, S, H), dtype=jnp.float32)
    wq = jax.random.uniform(kq, (H, D), jnp.float32, -bound, bound)
    bq = jax.random.uniform(kbq, (D,), jnp.float32, -bound, bound)
    wk = jax.random.uniform(kk, (H, D), jnp.float32, -bound, bound)
    bk = jax.random.uniform(kbk, (D,), jnp.float32, -bound, bound)
    wv = jax.random.uniform(kv, (H, D), jnp.float32, -bound, bound)
    bv = jax.random.uniform(kbv, (D,), jnp.float32, -bound, bound)

    out, probs = attention_head(x, wq, bq, wk, bk, wv, bv)
    jax.block_until_ready((out, probs))

    ref_out, ref_probs = _reference(x, wq, bq, wk, bk, wv, bv)
    assert out.shape == (B, S, D) and probs.shape == (B, S, S)
    # Slightly relaxed tolerance: approx (EUP) reciprocal in the softmax.
    assert jnp.allclose(out, ref_out, atol=2e-3, rtol=2e-3)
    assert jnp.allclose(probs, ref_probs, atol=2e-3, rtol=2e-3)

    # Exercise the reduced-HBM-traffic path (no probs output).
    out_only, _ = attention_head(x, wq, bq, wk, bk, wv, bv, with_probs=False)
    jax.block_until_ready(out_only)
    assert jnp.allclose(out_only, ref_out, atol=2e-3, rtol=2e-3)

    print("KERNEL_OK")
</pallas_src>

<mosaic_0001>
module attributes {stable_mosaic.version = 11 : i64} {
  func.func @kernel(%arg0: i32, %arg1: memref<8x32xf32, #tpu.memory_space<vmem>>, %arg2: memref<32x384xf32, #tpu.memory_space<vmem>>, %arg3: memref<1x384xf32, #tpu.memory_space<vmem>>, %arg4: memref<1x8x128xf32, #tpu.memory_space<vmem>>, %arg5: memref<1x8x128xf32, #tpu.memory_space<vmem>>) attributes {dimension_semantics = [#tpu.dimension_semantics<parallel>], iteration_bounds = array<i64: 2>, scalar_prefetch = 0 : i64, scratch_operands = 0 : i64, tpu.core_type = #tpu.core_type<tc>, window_params = [{transform_indices = @transform_0, window_bounds = array<i64: 8, 32>}, {pipeline_mode = #tpu.pipeline_mode<synchronous>, transform_indices = @transform_1, window_bounds = array<i64: 32, 384>}, {pipeline_mode = #tpu.pipeline_mode<synchronous>, transform_indices = @transform_2, window_bounds = array<i64: 1, 384>}, {transform_indices = @transform_3, window_bounds = array<i64: 1, 8, 128>}, {transform_indices = @transform_4, window_bounds = array<i64: 1, 8, 128>}]} {
    %c0 = arith.constant 0 : index
    %c0_0 = arith.constant 0 : index
    %0 = vector.load %arg1[%c0, %c0_0] : memref<8x32xf32, #tpu.memory_space<vmem>>, vector<8x32xf32>
    %c0_1 = arith.constant 0 : index
    %c0_2 = arith.constant 0 : index
    %1 = vector.load %arg2[%c0_1, %c0_2] : memref<32x384xf32, #tpu.memory_space<vmem>>, vector<32x384xf32>
    %cst = arith.constant dense<0.000000e+00> : vector<8x384xf32>
    %2 = tpu.matmul %0, %1, %cst {dimension_numbers = #tpu.dot_dimension_numbers<[1], [0], [0], [1], [0, 0, 1, 1], [], []>} : vector<8x32xf32>, vector<32x384xf32>, vector<8x384xf32> -> vector<8x384xf32>
    %c0_3 = arith.constant 0 : index
    %c0_4 = arith.constant 0 : index
    %3 = vector.load %arg3[%c0_3, %c0_4] : memref<1x384xf32, #tpu.memory_space<vmem>>, vector<1x384xf32>
    %4 = vector.broadcast %3 : vector<1x384xf32> to vector<8x384xf32>
    %5 = arith.addf %2, %4 : vector<8x384xf32>
    %6 = vector.shape_cast %5 : vector<8x384xf32> to vector<1x8x384xf32>
    %7 = vector.extract_strided_slice %6 {offsets = [0, 0, 0], sizes = [1, 8, 128], strides = [1, 1, 1]} : vector<1x8x384xf32> to vector<1x8x128xf32>
    %8 = vector.extract_strided_slice %6 {offsets = [0, 0, 128], sizes = [1, 8, 128], strides = [1, 1, 1]} : vector<1x8x384xf32> to vector<1x8x128xf32>
    %9 = vector.extract_strided_slice %6 {offsets = [0, 0, 256], sizes = [1, 8, 128], strides = [1, 1, 1]} : vector<1x8x384xf32> to vector<1x8x128xf32>
    "tpu.trace_start"() <{level = 10 : i32, message = "bqd,bkd->bqk"}> : () -> ()
    %cst_5 = arith.constant dense<0.000000e+00> : vector<1x8x8xf32>
    %10 = tpu.matmul %7, %8, %cst_5 {dimension_numbers = #tpu.dot_dimension_numbers<[2], [2], [1], [1], [0, 0, 0, 1, 1, 1], [0], [0]>} : vector<1x8x128xf32>, vector<1x8x128xf32>, vector<1x8x8xf32> -> vector<1x8x8xf32>
    "tpu.trace_stop"() : () -> ()
    %cst_6 = arith.constant dense<0xFF800000> : vector<1x8xf32>
    %11 = vector.multi_reduction <maximumf>, %10, %cst_6 [2] : vector<1x8x8xf32> to vector<1x8xf32>
    %12 = vector.shape_cast %11 : vector<1x8xf32> to vector<1x8x1xf32>
    %13 = vector.broadcast %12 : vector<1x8x1xf32> to vector<1x8x8xf32>
    %14 = arith.subf %10, %13 : vector<1x8x8xf32>
    %15 = math.exp %14 : vector<1x8x8xf32>
    %cst_7 = arith.constant dense<0.000000e+00> : vector<1x8xf32>
    %16 = vector.multi_reduction <add>, %15, %cst_7 [2] : vector<1x8x8xf32> to vector<1x8xf32>
    %17 = vector.shape_cast %16 : vector<1x8xf32> to vector<1x8x1xf32>
    %18 = tpu.reciprocal %17 {approx = true} : vector<1x8x1xf32> -> vector<1x8x1xf32>
    %19 = vector.broadcast %18 : vector<1x8x1xf32> to vector<1x8x8xf32>
    %20 = arith.mulf %15, %19 : vector<1x8x8xf32>
    "tpu.trace_start"() <{level = 10 : i32, message = "bqk,bkd->bqd"}> : () -> ()
    %cst_8 = arith.constant dense<0.000000e+00> : vector<1x8x128xf32>
    %21 = tpu.matmul %20, %9, %cst_8 {dimension_numbers = #tpu.dot_dimension_numbers<[2], [1], [1], [2], [0, 0, 0, 1, 1, 2], [0], [0]>} : vector<1x8x8xf32>, vector<1x8x128xf32>, vector<1x8x128xf32> -> vector<1x8x128xf32>
    "tpu.trace_stop"() : () -> ()
    %c0_9 = arith.constant 0 : index
    %c0_10 = arith.constant 0 : index
    %c0_11 = arith.constant 0 : index
    %22 = vector.load %arg4[%c0_9, %c0_10, %c0_11] : memref<1x8x128xf32, #tpu.memory_space<vmem>>, vector<1x8x128xf32>
    tpu.vector_store %arg4[%c0_9, %c0_10, %c0_11], %21 {strides = array<i32>} : memref<1x8x128xf32, #tpu.memory_space<vmem>>, vector<1x8x128xf32>,
    %cst_12 = arith.constant 0.000000e+00 : f32
    %23 = vector.broadcast %cst_12 : f32 to vector<1x8x120xf32>
    %24 = tpu.concatenate %20, %23 in 2 : vector<1x8x8xf32>, vector<1x8x120xf32> -> vector<1x8x128xf32>
    %c0_13 = arith.constant 0 : index
    %c0_14 = arith.constant 0 : index
    %c0_15 = arith.constant 0 : index
    %25 = vector.load %arg5[%c0_13, %c0_14, %c0_15] : memref<1x8x128xf32, #tpu.memory_space<vmem>>, vector<1x8x128xf32>
    tpu.vector_store %arg5[%c0_13, %c0_14, %c0_15], %24 {strides = array<i32>} : memref<1x8x128xf32, #tpu.memory_space<vmem>>, vector<1x8x128xf32>,
    return
  }
  func.func @transform_0(%arg0: i32) -> (i32, i32) {
    %c0_i32 = arith.constant 0 : i32
    %c0_i32_0 = arith.constant 0 : i32
    return %arg0, %c0_i32 : i32, i32
  }
  func.func @transform_1(%arg0: i32) -> (i32, i32) {
    %c0_i32 = arith.constant 0 : i32
    %c0_i32_0 = arith.constant 0 : i32
    %c0_i32_1 = arith.constant 0 : i32
    return %c0_i32, %c0_i32_0 : i32, i32
  }
  func.func @transform_2(%arg0: i32) -> (i32, i32) {
    %c0_i32 = arith.constant 0 : i32
    %c0_i32_0 = arith.constant 0 : i32
    %c0_i32_1 = arith.constant 0 : i32
    return %c0_i32, %c0_i32_0 : i32, i32
  }
  func.func @transform_3(%arg0: i32) -> (i32, i32, i32) {
    %c0_i32 = arith.constant 0 : i32
    %c0_i32_0 = arith.constant 0 : i32
    %c0_i32_1 = arith.constant 0 : i32
    return %arg0, %c0_i32, %c0_i32_0 : i32, i32, i32
  }
  func.func @transform_4(%arg0: i32) -> (i32, i32, i32) {
    %c0_i32 = arith.constant 0 : i32
    %c0_i32_0 = arith.constant 0 : i32
    %c0_i32_1 = arith.constant 0 : i32
    return %arg0, %c0_i32, %c0_i32_0 : i32, i32, i32
  }
}

</mosaic_0001>

<bundles_post_ra>
// kernel: tpu_custom_call.1
= control target key start
LH: loop header
LB: loop body
LE: loop exit
PB: predicated region body
PF: predicated region fallthrough
CT: control target
= control target key end

     0   :  { %10 = vsyncpa [#allocation3], 0  ;;  %s1287_s0 = inlined_call_operand.hbm [shape: f32[16,32], index: 0, kind: input, shape index: {}]   ;;  %s1288_s1 = inlined_call_operand.hbm [shape: f32[32,384], index: 1, kind: input, shape index: {}]   ;;  %s1289_s2 = inlined_call_operand.vmem [shape: f32[1,384], index: 2, kind: input, shape index: {}]   ;;  %s1290_s3 = inlined_call_operand.hbm [shape: f32[2,8,128], index: 3, kind: output, shape index: {0}]   ;;  %s1291_s4 = inlined_call_operand.hbm [shape: f32[2,8,128], index: 4, kind: output, shape index: {1}]  }
   0x1   :  { %12 = vsyncpa [#allocation3 + $0x1], 0 }
   0x2   :  { %13 = vsyncpa [#allocation6], 0 }
   0x3   :  { %14 = vsyncpa [#allocation4], 0 }
   0x4   :  { %16 = vsyncpa [#allocation4 + $0x1], 0 }
   0x5   :  { %17 = vsyncpa [#allocation9], 0 }
   0x6   :  { %19 = vsyncpa [#allocation9 + $0x1], 0  ;;  %s1047_s15 = smov 0   ;;  %s1049_s16 = smov 0  }
   0x7   :  { %s1051_s17 = smov 0   ;;  %s1053_s18 = smov 0  }
   0x8 LB: > { %s1068_s19 = sadd.s32 4294967295, %s1011_s18   ;;  %s716_s20 = sadd.s32 4294967294, %s1011_s18   ;;  %s1011_s18 = sphi %s1053_s18, %s1311_s18   ;;  %s1007_s17 = sphi %s1051_s17, %s1310_s17   ;;  %s1003_s16 = sphi %s1049_s16, %s1309_s16   ;;  %s999_s15 = sphi %s1047_s15, %s1308_s15  }
   0x9   : > { %p45_p0 = scmp.ne.s32.totalorder %s1003_s16, %s999_s15  ;;  %p1292_p1 = scmp.eq.s32.totalorder %s1068_s19, 0 }
   0xa   : > { %p117_p3 = scmp.eq.s32.totalorder %s716_s20, 1  ;;  %p717_p5 = scmp.ge.s32.totalorder %s1011_s18, 1 }
   0xb   : > { %p1077_p4 = por %p1292_p1, %p45_p0  ;;  %p150_p7 = scmp.lt.s32.totalorder %s1011_s18, 3 }
   0xc   : > { %p1082_p6 = por %p117_p3, %p45_p0  ;;  %s1013_s24 = smov [#allocation5]  }
   0xd   : > { %s1295_s21 = scalar_select %p1077_p4, 1, 0 }
   0xe   : > { %s1296_s22 = scalar_select %p1082_p6, 1, 0 }
   0xf   : > { %p1087_p8 = pnand %p717_p5, %p150_p7  ;;  %s162_s25 = sshll.u32 %s1013_s24, 4  ;;  %s1091_s25 = int_to_ptr.vmem [resolvable:$true] %s162_s25 }
  0x10   : > { %s1103_s27 = sadd.s32 1, %s1011_s18   ;;  %s32_s28 = sadd.s32 1, %s1007_s17 }
  0x11   : > { %s1297_s23 = scalar_select %p1087_p8, 1, 0 }
  0x12   : > { %p790_p9 = pneg %p1087_p8  ;;  %s29_s29 = ssub.s32 %s1011_s18, %s1103_s27 }
  0x13   : > { %s851_s6 = scalar_lea.hbm %s1288_s1, 1536 }
  0x14   : > { %p1098_p11 = pnand %p790_p9, %p1292_p1  ;;  %p852_p12 = scmp.ne.s32.totalorder %s1288_s1, %s851_s6 }
  0x15   : > { %p858_p5 = scmp.lt.u32.totalorder %s851_s6, %s1288_s1 }
  0x16   : > { %p853_p13 = pneg %p1098_p11 }
  0x18   : > { %p854_p0 = pnand %p853_p13, %p852_p12 }
  0x1a   : > { %p855_p3 = pneg %p854_p0 }
  0x1c   : > { %p860_p7 = pnand %p858_p5, %p855_p3 }
  0x1e   : > { %863 = shalt.err (!%p860_p7)
}
  0x1f   : > { %s864_s11 = scalar_lea.vmem %s1091_s25, 1536  ;;  %p872_p2 = scmp.lt.s32.totalorder %s1091_s25, %s1091_s25 }
  0x20   : > { %p865_p9 = scmp.ne.s32.totalorder %s1091_s25, %s864_s11  ;;  %p873_p6 = scmp.lt.s32.totalorder %s864_s11, %s864_s11 }
  0x22   : > { %p867_p10 = pnand %p865_p9, %p853_p13  ;;  %p874_p4 = por %p873_p6, %p872_p2 }
  0x24   : > { %p868_p1 = pneg %p867_p10 }
  0x26   : > { %p875_p8 = pnand %p874_p4, %p868_p1 }
  0x28   : > { %878 = shalt.err (!%p875_p8)
}
  0x29   : > { %s1014_s12 = smov 384   ;;  %s1015_s13 = smov 24  }
  0x2a   : > { %793 = dma.hbm_to_vmem [thread:$0]  (!%p1098_p11), %s1288_s1, 1536, %s1091_s25, [#allocation6], %s1014_s12, %s1014_s12, %s1015_s13  }
  0x2b   : > { %p30_p2 = scmp.eq.s32.totalorder %s29_s29, 0  ;;  %p39_p1 = scmp.ne.s32.totalorder %s1007_s17, %s1003_s16 }
  0x2c   : > { %p40_p4 = scmp.eq.s32.totalorder %s1011_s18, 0  ;;  %p806_p6 = scmp.lt.s32.totalorder %s1011_s18, 2 }
  0x2d   : > { %s1134_s24 = scalar_select %p30_p2, %s1007_s17, %s32_s28  }
  0x2e   : > { %p41_p8 = por %p40_p4, %p39_p1  ;;  %p1299_p10 = scmp.eq.s32.totalorder %s1068_s19, 1 }
  0x2f   : > { %s179_s5 = sand.u32 1, %s1007_s17   ;;  %s721_s6 = sshll.u32 %s1011_s18, 7 }
  0x30   : > { %p1138_p12 = por %p1299_p10, %p39_p1  ;;  %s720_s7 = sshll.u32 %s179_s5, 3 }
  0x31   : > { %s1147_s9 = scalar_lea.hbm %s1287_s0, %s721_s6  ;;  %s183_s25 = scalar_lea.vmem [#allocation2], %s720_s7 }
  0x32   : > { %s190_s28 = sshll.u32 %s183_s25, 4  ;;  %p1149_p11 = pnand %p806_p6, %p41_p8  ;;  %s1153_s28 = int_to_ptr.vmem [resolvable:$true] %s190_s28 }
  0x33   : > { %s180_s10 = scalar_lea.sflag [#allocation3], %s179_s5  ;;  %s879_s11 = scalar_lea.hbm %s1147_s9, 128 }
  0x34   : > { %p880_p13 = scmp.ne.s32.totalorder %s1147_s9, %s879_s11  ;;  %p881_p0 = pneg %p1149_p11 }
  0x35   : > { %s884_s14 = scalar_lea.hbm %s1287_s0, 256  ;;  %p885_p7 = scmp.lt.u32.totalorder %s1147_s9, %s1287_s0 }
  0x36   : > { %p882_p3 = pnand %p881_p0, %p880_p13  ;;  %p886_p9 = scmp.lt.u32.totalorder %s884_s14, %s879_s11 }
  0x37   : > { %p888_p1 = scmp.lt.u32.totalorder %s879_s11, %s1147_s9 }
  0x38   : > { %p883_p5 = pneg %p882_p3  ;;  %p887_p2 = por %p886_p9, %p885_p7 }
  0x3a   : > { %p889_p4 = por %p888_p1, %p887_p2 }
  0x3c   : > { %p890_p6 = pnand %p889_p4, %p883_p5 }
  0x3e   : > { %893 = shalt.err (!%p890_p6)
}
  0x3f   : > { %s894_s5 = scalar_lea.vmem %s1153_s28, 128  ;;  %s1016_s7 = smov [#allocation2]  }
  0x40   : > { %p895_p8 = scmp.ne.s32.totalorder %s1153_s28, %s894_s5  ;;  %s899_s26 = sshll.u32 %s1016_s7, 4  ;;  %s900_s26 = int_to_ptr.vmem [resolvable:$false] %s899_s26 }
  0x41   : > { %s901_s8 = scalar_lea.vmem %s900_s26, 256  ;;  %p902_p3 = scmp.lt.s32.totalorder %s1153_s28, %s900_s26 }
  0x42   : > { %p897_p10 = pnand %p895_p8, %p881_p0  ;;  %p903_p7 = scmp.lt.s32.totalorder %s901_s8, %s894_s5 }
  0x44   : > { %p898_p13 = pneg %p897_p10  ;;  %p904_p9 = por %p903_p7, %p902_p3 }
  0x46   : > { %p905_p2 = pnand %p904_p9, %p898_p13 }
  0x48   : > { %908 = shalt.err (!%p905_p2)
}
  0x49   : > { %797 = dma.hbm_to_vmem [thread:$0]  (!%p1149_p11), %s1147_s9, 128, %s1153_s28, %s180_s10  }
  0x4a   : > { %p1302_p5 = scmp.ne.s32.totalorder %s1297_s23, 0 }
  0x4b   : > { %s1183_s25 = sand.u32 (!%p1302_p5), 1, %s1003_s16   ;;  %p1303_p0 = scmp.ne.s32.totalorder (!%p1302_p5), %s1295_s21, 0 }
  0x4c   : > { %199 = sbr.rel (%p1302_p5) target bundleno = 1068 (0x42c), region = 32  ;;  %s1186_s11 = sshll.u32 (!%p1302_p5), %s1183_s25, 3 }
  0x4d   : > { %s202_s12 = scalar_lea.sflag (!%p1302_p5), [#allocation3], %s1183_s25  ;;  %s205_s13 = scalar_lea.vmem (!%p1302_p5), [#allocation2], %s1186_s11 }
  0x53   : > { %982 = dma.done.wait (%p1303_p0), %s202_s12, 128  }
  0x54   : > { %984 = vsyncadd (%p1303_p0), %s202_s12, 4294967168  ;;  %p1304_p11 = scmp.eq.s32.totalorder %s1068_s19, 0 }
  0x56   : > { %986 = dma.done.wait (%p1304_p11), [#allocation6], 1536   ;;  %p1305_p1 = pmov %p1304_p11 }
  0x57   : > { %v1017_v0 = vmov 0.0   ;;  %v241_v1 = vld [vmem:[#allocation5 + $0x8] sm:$0xff]  ;;  %v244_v2 = vld [vmem:[#allocation5 + $0x20] sm:$0xff]  ;;  %v243_v5 = vld [vmem:[#allocation5 + $0x18] sm:$0xff]  ;;  %vm269_vm0 = vcmask 261120   ;;  %vm1018_vm1 = vmmov 0   ;;  %v254_v14 = vlaneseq }
  0x58   : > { %988 = vsyncadd (%p1305_p1), [#allocation6], 4294965760  ;;  %337 = vmatprep.mubr.f32.mxu0 %v1017_v0  ;;  %v240_v3 = vld [vmem:[#allocation5] sm:$0xff]  ;;  %v766_v4 = vpack.c.bf16 %v244_v2, %v241_v1  ;;  %v247_v6 = vld [vmem:[#allocation5 + $0x38] sm:$0xff]  ;;  %753 = vmatprep.mubr.msk.f32.mxu1 %vm1018_vm1, %v1017_v0  ;;  %v1019_v28 = vmov 0.0|0.0   ;;  %vm484_vm2 = vcmask 64512  }
  0x59   : > { %v250_v7 = vld [vmem:[#allocation5 + $0x50] sm:$0xff]  ;;  %v768_v8 = vpack.c.bf16 %v243_v5, %v240_v3  ;;  %v249_v11 = vld [vmem:[#allocation5 + $0x48] sm:$0xff]  ;;  %v255_v15 = vshrl.u32 %v254_v14, 7  ;;  %v248_v27 = vld [vmem:[#allocation5 + $0x40] sm:$0xff]  ;;  %774 = vmatprep.subr.bf16.mxu1 %v1019_v28  ;;  %s238_s9 = scalar_lea.vmem [#allocation8], %s1186_s11  ;;  %s732_s28 = sshll.u32 %s1068_s19, 7 }
  0x5a   : > { %v770_v9 = vpack.c.bf16 %v250_v7, %v247_v6  ;;  %v246_v10 = vld [vmem:[#allocation5 + $0x30] sm:$0xff]  ;;  %767 = vmatprep.subr.bf16.mxu0 %v766_v4  ;;  %v245_v26 = vld [vmem:[#allocation5 + $0x28] sm:$0xff]  ;;  %v251_v30 = vld [vmem:[#allocation5 + $0x58] sm:$0xff]  ;;  %s1217_s14 = scalar_lea.hbm %s1291_s4, %s732_s28  ;;  %s604_s20 = sshll.u32 %s238_s9, 4  ;;  %s605_s20 = int_to_ptr.vmem [resolvable:$true] %s604_s20 }
  0x5b   : > { %769 = vmatpush1.bf16.msra.mxu0 %v768_v8  ;;  %v772_v12 = vpack.c.bf16 %v249_v11, %v246_v10  ;;  %v239_v13 = vld [vmem:[%s205_s13] sm:$0xff]  ;;  %v260_v16 = vsub.s32 1, %v255_v15  ;;  %v256_v18 = vsub.s32 0, %v255_v15  ;;  %v778_v31 = vpack.c.bf16 %v251_v30, %v248_v27  ;;  %s578_s6 = scalar_lea.sflag [#allocation9], %s1183_s25  ;;  %s909_s5 = scalar_lea.vmem %s605_s20, 128 }
  0x5c   : > { %771 = vmatprep.subr.bf16.mxu0 %v770_v9  ;;  %v252_v17 = vld [vmem:[%s1289_s2] sm:$0x7]  ;;  %v264_v40 = vsub.s32 2, %v255_v15  ;;  %p910_p4 = scmp.ne.s32.totalorder %s605_s20, %s909_s5  ;;  %s1020_s7 = smov [#allocation8]  }
  0x5d   : > { %v261_v19 = vrot.slane %v252_v17, %v260_v16  ;;  %v257_v21 = vrot.slane %v252_v17, %v256_v18  ;;  %v242_v25 = vld [vmem:[#allocation5 + $0x10] sm:$0xff]  ;;  %s913_s26 = sshll.u32 %s1020_s7, 4  ;;  %s914_s26 = int_to_ptr.vmem [resolvable:$false] %s913_s26 }
  0x5e   : > { %v775_v29 = vpack.c.bf16 %v245_v26, %v242_v25  ;;  %v265_v41 = vrot.slane %v252_v17, %v264_v40  ;;  %p911_p6 = pnand %p910_p4, %p1138_p12  ;;  %s915_s8 = scalar_lea.vmem %s914_s26, 256 }
  0x5f   : > { %773 = vmatpush1.bf16.msra.mxu0 %v772_v12  ;;  %p916_p10 = scmp.lt.s32.totalorder %s605_s20, %s914_s26  ;;  %p917_p13 = scmp.lt.s32.totalorder %s915_s8, %s909_s5 }
  0x60   : > { %756 = vmatprep.subr.mxu0 %v1017_v0  ;;  %776 = vmatpush3.bf16.msra.mxu1 %v775_v29  ;;  %p912_p8 = pneg %p911_p6 }
  0x61   : > { %777 = vmatprep.subr.bf16.mxu1 %v1019_v28  ;;  %p918_p3 = por %p917_p13, %p916_p10 }
  0x62   : > { %727 = vmatmul.mubr.msk.f32.vlgmr.msra.gmra.mrb[0].mxu0 %vm269_vm0, %v239_v13 }
  0x63   : > { %758 = vmatprep.mubr.msk.f32.mxu0 %vm1018_vm1, %v1017_v0  ;;  %p919_p7 = pnand %p918_p3, %p912_p8 }
  0x64   : > { %779 = vmatpush3.bf16.msra.mxu1 %v778_v31 }
  0x65   : > { %761 = vmatprep.subr.mxu1 %v1017_v0 }
  0x67   : > { %754 = vmatmul.mubr.msk.f32.vlgmr.msra.gmra.mrb[0].mxu1 %vm269_vm0, %v239_v13 }
  0x68   : > { %763 = vmatprep.mubr.msk.f32.mxu1 %vm1018_vm1, %v1017_v0 }
 0x135   : > { %v339_v20 = vpop.f32.mrb[0].mxu0 }
 0x136   : > { %v341_v22 = vpop.f32.mrb[1].mxu0  ;;  %v340_v24 = vadd.f32 %v339_v20, %v257_v21 }
 0x137   : > { %v342_v23 = vadd.f32 %v341_v22, %v261_v19 }
 0x139   : > { %757 = vmatpush3.xpose.msra.mxu0 %v342_v23 }
 0x13a   : > { %v410_v42 = vpop.f32.mrb[0].mxu1 }
 0x13b   : > { %v755_v43 = vpop.f32.mrb[1].mxu1  ;;  %v411_v44 = vadd.f32 %v410_v42, %v265_v41 }
 0x13c   : > { %759 = vmatmul.mubr.f32.vlgmr.msra.gmra.mrb[2].mxu0 %v340_v24 }
 0x13d   : > { %762 = vmatpush3.msra.mxu1 %v411_v44 }
 0x20f   : > { %v480_v32 = vpop.f32.mrb[2].mxu0 }
 0x210   : > { %v760_v33 = vpop.f32.mrb[3].mxu0  ;;  %v485_v34 = vsel %vm484_vm2, %v480_v32, -inf }
 0x211   : > { %486 = vmax.xlane.f32.xlu0 %v485_v34 }
 0x29e   : > { %v487_v35 = vpop.xlane.xlu0 %486 }
 0x29f   : > { %v488_v36 = vsub.f32 %v480_v32, %v487_v35 }
 0x2a1   : > { %v489_v37 = vmul.f32 1.442695, %v488_v36 }
 0x2a3   : > { %847 = vpow2.f32 %v489_v37 }
 0x2ad   : > { %v848_v38 = vpop.eup %847 }
 0x2ae   : > { %v491_v39 = vsel %vm484_vm2, %v848_v38, 0.0 }
 0x2af   : > { %492 = vadd.xlane.f32.xlu0 %v491_v39 }
 0x33c   : > { %v493_v45 = vpop.xlane.xlu0 %492 }
 0x33d   : > { %849 = vrcp.f32 %v493_v45 }
 0x347   : > { %v850_v46 = vpop.eup %849 }
 0x348   : > { %v495_v47 = vmul.f32 %v850_v46, %v848_v38 }
 0x34a   : > { %764 = vmatmul.mubr.msk.f32.vlgmr.msra.gmra.mrb[2].mxu1 %vm484_vm2, %v495_v47  ;;  %v570_v48 = vsel %vm484_vm2, %v495_v47, 0.0 }
 0x34b   : > { %571 = vst [vmem:[%s238_s9] sm:$0xff] %v570_v48 }
 0x34c   : > { %922 = shalt.err (!%p919_p7)
}
 0x34d   : > { %s923_s12 = scalar_lea.hbm %s1217_s14, 128  ;;  %s927_s23 = scalar_lea.hbm %s1291_s4, 256 }
 0x34e   : > { %p924_p9 = scmp.ne.s32.totalorder %s1217_s14, %s923_s12  ;;  %p928_p0 = scmp.lt.u32.totalorder %s1217_s14, %s1291_s4 }
 0x34f   : > { %p929_p11 = scmp.lt.u32.totalorder %s927_s23, %s923_s12  ;;  %p931_p4 = scmp.lt.u32.totalorder %s923_s12, %s1217_s14 }
 0x350   : > { %p925_p2 = pnand %p924_p9, %p1138_p12 }
 0x351   : > { %p930_p1 = por %p929_p11, %p928_p0 }
 0x352   : > { %p926_p5 = pneg %p925_p2 }
 0x353   : > { %p932_p6 = por %p931_p4, %p930_p1 }
 0x355   : > { %p933_p8 = pnand %p932_p6, %p926_p5 }
 0x357   : > { %936 = shalt.err (!%p933_p8)
}
 0x358   : > { %787 = dma.vmem_to_hbm [thread:$0]  (%p1138_p12), %s605_s20, 128, %s1217_s14, %s578_s6  }
 0x359   : > { %s231_s10 = scalar_lea.vmem [#allocation7], %s1186_s11  ;;  %s1245_s8 = scalar_lea.hbm %s1290_s3, %s732_s28 }
 0x35a   : > { %s591_s5 = sshll.u32 %s231_s10, 4  ;;  %s573_s12 = scalar_lea.sflag [#allocation4], %s1183_s25  ;;  %s1238_s5 = int_to_ptr.vmem [resolvable:$true] %s591_s5 }
 0x35b   : > { %s937_s13 = scalar_lea.vmem %s1238_s5, 128  ;;  %s1021_s11 = smov [#allocation7]  }
 0x35c   : > { %p938_p10 = scmp.ne.s32.totalorder %s1238_s5, %s937_s13  ;;  %s941_s14 = sshll.u32 %s1021_s11, 4  ;;  %s942_s14 = int_to_ptr.vmem [resolvable:$false] %s941_s14 }
 0x35d   : > { %s943_s19 = scalar_lea.vmem %s942_s14, 256  ;;  %p944_p7 = scmp.lt.s32.totalorder %s1238_s5, %s942_s14 }
 0x35e   : > { %p939_p13 = pnand %p938_p10, %p1138_p12  ;;  %p945_p9 = scmp.lt.s32.totalorder %s943_s19, %s937_s13 }
 0x360   : > { %p940_p3 = pneg %p939_p13  ;;  %p946_p2 = por %p945_p9, %p944_p7 }
 0x362   : > { %p947_p5 = pnand %p946_p2, %p940_p3 }
 0x41d   : > { %v565_v49 = vpop.f32.mrb[2].mxu1 }
 0x41e   : > { %569 = vst [vmem:[%s231_s10] sm:$0xff] %v565_v49  ;;  %v765_v50 = vpop.f32.mrb[3].mxu1 }
 0x41f   : > { %950 = shalt.err (!%p947_p5)
}
 0x420   : > { %s951_s25 = scalar_lea.hbm %s1245_s8, 128  ;;  %s955_s6 = scalar_lea.hbm %s1290_s3, 256 }
 0x421   : > { %p952_p0 = scmp.ne.s32.totalorder %s1245_s8, %s951_s25  ;;  %p956_p4 = scmp.lt.u32.totalorder %s1245_s8, %s1290_s3 }
 0x422   : > { %p957_p6 = scmp.lt.u32.totalorder %s955_s6, %s951_s25  ;;  %p959_p10 = scmp.lt.u32.totalorder %s951_s25, %s1245_s8 }
 0x423   : > { %p953_p11 = pnand %p952_p0, %p1138_p12 }
 0x424   : > { %p958_p8 = por %p957_p6, %p956_p4 }
 0x425   : > { %p954_p1 = pneg %p953_p11 }
 0x426   : > { %p960_p13 = por %p959_p10, %p958_p8 }
 0x428   : > { %p961_p3 = pnand %p960_p13, %p954_p1 }
 0x42a   : > { %964 = shalt.err (!%p961_p3)
}
 0x42b   : > { %786 = dma.vmem_to_hbm [thread:$0]  (%p1138_p12), %s1238_s5, 128, %s1245_s8, %s573_s12  }
 0x42c PF: > { %s616_s9 = sand.u32 1, %s999_s15   ;;  %p1306_p7 = scmp.ne.s32.totalorder %s1296_s22, 0 }
 0x42d   : > { %p1307_p9 = scmp.ge.s32.totalorder %s1011_s18, 2  ;;  %s617_s29 = scalar_lea.sflag [#allocation4], %s616_s9 }
 0x42f   : > { %p799_p2 = pnand %p1307_p9, %p1306_p7 }
 0x431   : > { %990 = dma.done.wait (!%p799_p2), %s617_s29, 128  }
 0x432   : > { %992 = vsyncadd (!%p799_p2), %s617_s29, 4294967168  ;;  %s626_s10 = scalar_lea.sflag [#allocation9], %s616_s9 }
 0x433   : > { %994 = dma.done.wait (!%p799_p2), %s626_s10, 128  }
 0x434   : > { %996 = vsyncadd (!%p799_p2), %s626_s10, 4294967168  ;;  %p22_p12 = scmp.ge.s32.totalorder %s1103_s27, 4   ;;  %s1308_s15 = smov %s1003_s16 }
 0x435   : > { %s1309_s16 = smov %s1007_s17  ;;  %s1310_s17 = smov %s1134_s24 }
 0x436   : > { %s1311_s18 = smov %s1103_s27  ;;  %24 = sbr.rel (!%p22_p12) target bundleno = 8 (0x8), region = 98 }
 0x43d   :  { %631 = vsyncpa [#allocation3], 1 }
 0x43e   :  { %633 = vsyncpa [#allocation3 + $0x1], 1 }
 0x43f   :  { %634 = vsyncpa [#allocation6], 1 }
 0x440   :  { %635 = vsyncpa [#allocation4], 1 }
 0x441   :  { %637 = vsyncpa [#allocation4 + $0x1], 1 }
 0x442   :  { %638 = vsyncpa [#allocation9], 1 }
 0x443   :  { %640 = vsyncpa [#allocation9 + $0x1], 1 }

</bundles_post_ra>
